<compile_context>
chip_gen: v5e
topology: v5e:2x2
jax: 0.10.0
libtpu: 0.0.40
codegen_flags: <defaults>
</compile_context>

<pallas_src>
import jax
import jax.numpy as jnp
from jax.experimental import pallas as pl
from jax.experimental.pallas import tpu as pltpu


# ----------------------------------------------------------------------------
# Pallas kernel
# ----------------------------------------------------------------------------

def _grn_kernel(x_ref, g_ref, b_ref, o_ref):
    # x_ref / o_ref: (Bt, HW, C) in the caller's dtype, channels on the lane axis.
    # g_ref / b_ref: (1, C) f32 gamma / beta (resident across all grid steps).

    # --- Pass 1: per-sample, per-channel L2 norm over spatial positions. ---
    # Upcast once; accumulate the sum of squares in f32 (needed for accuracy
    # and avoids per-op mixed-precision conversions on v5e).
    x32 = x_ref[...].astype(jnp.float32)                     # (Bt, HW, C)
    ss = jnp.sum(x32 * x32, axis=1, keepdims=True)           # (Bt, 1, C) sublane reduce
    gx = jnp.sqrt(ss)                                        # (Bt, 1, C)
    denom = jnp.mean(gx, axis=-1, keepdims=True) + 1e-6      # (Bt, 1, 1) lane reduce
    nx = gx / denom                                          # (Bt, 1, C)

    # Fold gamma and the "+ x" residual into one per-channel scale:
    #   gamma*(x*Nx) + beta + x == x * (gamma*Nx + 1) + beta
    scale = g_ref[...] * nx + 1.0                            # (Bt, 1, C)

    # --- Pass 2 (epilogue): single fused mul+add sweep over the slab. ---
    # Re-read x from VMEM (near-free vld) instead of reusing the Python value
    # above, so the upcast slab's live range does not span the whole kernel.
    x2 = x_ref[...].astype(jnp.float32)
    o_ref[...] = (x2 * scale + b_ref[...]).astype(o_ref.dtype)


# ----------------------------------------------------------------------------
# Wrapper
# ----------------------------------------------------------------------------

def grn(x, gamma, beta, *, vmem_block_budget_bytes=8 << 20):
    """GRN forward.

    x: (N, H, W, C) channels-last, any float dtype (output keeps x.dtype).
    gamma, beta: (1, 1, 1, C).
    """
    n, h, w, c = x.shape
    hw = h * w
    xr = x.reshape(n, hw, c)                       # no dtype cast: native I/O
    g = gamma.reshape(1, c).astype(jnp.float32)
    b = beta.reshape(1, c).astype(jnp.float32)

    # Samples per block: largest divisor of n whose (input + output, double-
    # buffered ~4x) block footprint fits the budget, while keeping at least 2
    # grid steps when n >= 2 so both v7x TensorCores get work.
    itemsize = jnp.dtype(x.dtype).itemsize
    per_sample_bytes = hw * c * itemsize
    max_bt = max(1, vmem_block_budget_bytes // (4 * per_sample_bytes))
    min_steps = 2 if n >= 2 else 1
    bt = 1
    for d in range(1, n + 1):
        if n % d == 0 and d <= max_bt and (n // d) >= min_steps:
            bt = d
    grid = (n // bt,)

    out = pl.pallas_call(
        _grn_kernel,
        out_shape=jax.ShapeDtypeStruct((n, hw, c), x.dtype),
        grid=grid,
        in_specs=[
            pl.BlockSpec((bt, hw, c), lambda i: (i, 0, 0)),   # bt samples / step
            pl.BlockSpec((1, c), lambda i: (0, 0)),           # gamma (resident)
            pl.BlockSpec((1, c), lambda i: (0, 0)),           # beta  (resident)
        ],
        out_specs=pl.BlockSpec((bt, hw, c), lambda i: (i, 0, 0)),
        compiler_params=pltpu.CompilerParams(
            dimension_semantics=("parallel",)),               # megacore on v7x
    )(xr, g, b)
    return out.reshape(n, h, w, c)


# Pure-JAX reference for correctness checking.
def grn_ref(x, gamma, beta):
    xf = x.astype(jnp.float32)
    gx = jnp.sqrt(jnp.sum(jnp.square(xf), axis=(1, 2), keepdims=True))
    nx = gx / (jnp.mean(gx, axis=-1, keepdims=True) + 1e-6)
    return (gamma.astype(jnp.float32) * (xf * nx)
            + beta.astype(jnp.float32) + xf)


# ----------------------------------------------------------------------------

if __name__ == "__main__":
    key = jax.random.PRNGKey(0)
    kx, kg, kb = jax.random.split(key, 3)

    # Small, lane-dense shapes: batch=2, 16x16 spatial, dim (channels) = 128.
    N, H, W, C = 2, 16, 16, 128
    x = jax.random.normal(kx, (N, H, W, C), jnp.float32)
    # Module initializes gamma/beta to zeros (output == x); use small random
    # values here so the normalization path is actually exercised.
    gamma = 0.1 * jax.random.normal(kg, (1, 1, 1, C), jnp.float32)
    beta = 0.1 * jax.random.normal(kb, (1, 1, 1, C), jnp.float32)

    fwd = jax.jit(grn)

    # f32 path
    out = fwd(x, gamma, beta)
    jax.block_until_ready(out)
    ref = grn_ref(x, gamma, beta)
    assert out.shape == (N, H, W, C)
    assert out.dtype == x.dtype
    assert bool(jnp.all(jnp.isfinite(out)))
    assert bool(jnp.allclose(out, ref, rtol=1e-5, atol=1e-5)), \
        float(jnp.max(jnp.abs(out - ref)))

    # bf16 native-dtype I/O path (stats still accumulated in f32 in-kernel).
    x_bf16 = x.astype(jnp.bfloat16)
    out_bf16 = fwd(x_bf16, gamma, beta)
    jax.block_until_ready(out_bf16)
    assert out_bf16.dtype == jnp.bfloat16
    assert bool(jnp.all(jnp.isfinite(out_bf16.astype(jnp.float32))))
    assert bool(jnp.allclose(out_bf16.astype(jnp.float32), ref,
                             rtol=5e-2, atol=5e-2))

    print("KERNEL_OK")
</pallas_src>

<mosaic_0001>
module attributes {stable_mosaic.version = 11 : i64} {
  func.func @_grn_kernel(%arg0: i32, %arg1: memref<1x256x128xf32, #tpu.memory_space<vmem>>, %arg2: memref<1x128xf32, #tpu.memory_space<vmem>>, %arg3: memref<1x128xf32, #tpu.memory_space<vmem>>, %arg4: memref<1x256x128xf32, #tpu.memory_space<vmem>>) attributes {dimension_semantics = [#tpu.dimension_semantics<parallel>], iteration_bounds = array<i64: 2>, scalar_prefetch = 0 : i64, scratch_operands = 0 : i64, tpu.core_type = #tpu.core_type<tc>, window_params = [{transform_indices = @transform_0, window_bounds = array<i64: 1, 256, 128>}, {pipeline_mode = #tpu.pipeline_mode<synchronous>, transform_indices = @transform_1, window_bounds = array<i64: 1, 128>}, {pipeline_mode = #tpu.pipeline_mode<synchronous>, transform_indices = @transform_2, window_bounds = array<i64: 1, 128>}, {transform_indices = @transform_3, window_bounds = array<i64: 1, 256, 128>}]} {
    %c0 = arith.constant 0 : index
    %c0_0 = arith.constant 0 : index
    %c0_1 = arith.constant 0 : index
    %0 = vector.load %arg1[%c0, %c0_0, %c0_1] : memref<1x256x128xf32, #tpu.memory_space<vmem>>, vector<1x256x128xf32>
    %1 = arith.mulf %0, %0 : vector<1x256x128xf32>
    %cst = arith.constant dense<0.000000e+00> : vector<1x128xf32>
    %2 = vector.multi_reduction <add>, %1, %cst [1] : vector<1x256x128xf32> to vector<1x128xf32>
    %3 = vector.shape_cast %2 : vector<1x128xf32> to vector<1x1x128xf32>
    %4 = math.sqrt %3 : vector<1x1x128xf32>
    %cst_2 = arith.constant dense<0.000000e+00> : vector<1x1xf32>
    %5 = vector.multi_reduction <add>, %4, %cst_2 [2] : vector<1x1x128xf32> to vector<1x1xf32>
    %6 = vector.shape_cast %5 : vector<1x1xf32> to vector<1x1x1xf32>
    %cst_3 = arith.constant 1.280000e+02 : f32
    %7 = vector.broadcast %cst_3 : f32 to vector<1x1x1xf32>
    %8 = arith.divf %6, %7 : vector<1x1x1xf32>
    %cst_4 = arith.constant 9.99999997E-7 : f32
    %9 = vector.broadcast %cst_4 : f32 to vector<1x1x1xf32>
    %10 = arith.addf %8, %9 : vector<1x1x1xf32>
    %11 = vector.broadcast %10 : vector<1x1x1xf32> to vector<1x1x128xf32>
    %12 = arith.divf %4, %11 : vector<1x1x128xf32>
    %c0_5 = arith.constant 0 : index
    %c0_6 = arith.constant 0 : index
    %13 = vector.load %arg2[%c0_5, %c0_6] : memref<1x128xf32, #tpu.memory_space<vmem>>, vector<1x128xf32>
    %14 = vector.shape_cast %13 : vector<1x128xf32> to vector<1x1x128xf32>
    %15 = arith.mulf %14, %12 : vector<1x1x128xf32>
    %cst_7 = arith.constant 1.000000e+00 : f32
    %16 = vector.broadcast %cst_7 : f32 to vector<1x1x128xf32>
    %17 = arith.addf %15, %16 : vector<1x1x128xf32>
    %c0_8 = arith.constant 0 : index
    %c0_9 = arith.constant 0 : index
    %c0_10 = arith.constant 0 : index
    %18 = vector.load %arg1[%c0_8, %c0_9, %c0_10] : memref<1x256x128xf32, #tpu.memory_space<vmem>>, vector<1x256x128xf32>
    %19 = vector.broadcast %17 : vector<1x1x128xf32> to vector<1x256x128xf32>
    %20 = arith.mulf %18, %19 : vector<1x256x128xf32>
    %c0_11 = arith.constant 0 : index
    %c0_12 = arith.constant 0 : index
    %21 = vector.load %arg3[%c0_11, %c0_12] : memref<1x128xf32, #tpu.memory_space<vmem>>, vector<1x128xf32>
    %22 = vector.shape_cast %21 : vector<1x128xf32> to vector<1x1x128xf32>
    %23 = vector.broadcast %22 : vector<1x1x128xf32> to vector<1x256x128xf32>
    %24 = arith.addf %20, %23 : vector<1x256x128xf32>
    %c0_13 = arith.constant 0 : index
    %c0_14 = arith.constant 0 : index
    %c0_15 = arith.constant 0 : index
    %25 = vector.load %arg4[%c0_13, %c0_14, %c0_15] : memref<1x256x128xf32, #tpu.memory_space<vmem>>, vector<1x256x128xf32>
    tpu.vector_store %arg4[%c0_13, %c0_14, %c0_15], %24 {strides = array<i32>} : memref<1x256x128xf32, #tpu.memory_space<vmem>>, vector<1x256x128xf32>,
    return
  }
  func.func @transform_0(%arg0: i32) -> (i32, i32, i32) {
    %c0_i32 = arith.constant 0 : i32
    %c0_i32_0 = arith.constant 0 : i32
    %c0_i32_1 = arith.constant 0 : i32
    return %arg0, %c0_i32, %c0_i32_0 : i32, i32, i32
  }
  func.func @transform_1(%arg0: i32) -> (i32, i32) {
    %c0_i32 = arith.constant 0 : i32
    %c0_i32_0 = arith.constant 0 : i32
    %c0_i32_1 = arith.constant 0 : i32
    return %c0_i32, %c0_i32_0 : i32, i32
  }
  func.func @transform_2(%arg0: i32) -> (i32, i32) {
    %c0_i32 = arith.constant 0 : i32
    %c0_i32_0 = arith.constant 0 : i32
    %c0_i32_1 = arith.constant 0 : i32
    return %c0_i32, %c0_i32_0 : i32, i32
  }
  func.func @transform_3(%arg0: i32) -> (i32, i32, i32) {
    %c0_i32 = arith.constant 0 : i32
    %c0_i32_0 = arith.constant 0 : i32
    %c0_i32_1 = arith.constant 0 : i32
    return %arg0, %c0_i32, %c0_i32_0 : i32, i32, i32
  }
}

</mosaic_0001>

<bundles_post_ra>
// kernel: grn.1
= control target key start
LH: loop header
LB: loop body
LE: loop exit
PB: predicated region body
PF: predicated region fallthrough
CT: control target
= control target key end

     0   :  { %8 = vsyncpa [#allocation3], 0  ;;  %s1156_s0 = inlined_call_operand.hbm [shape: f32[2,256,128], index: 0, kind: input, shape index: {}]   ;;  %s1157_s1 = inlined_call_operand.vmem [shape: f32[1,128], index: 1, kind: input, shape index: {}]   ;;  %s1158_s2 = inlined_call_operand.vmem [shape: f32[1,128], index: 2, kind: input, shape index: {}]   ;;  %s1159_s3 = inlined_call_operand.hbm [shape: f32[2,256,128], index: 3, kind: output, shape index: {}]  }
   0x1   :  { %10 = vsyncpa [#allocation3 + $0x1], 0 }
   0x2   :  { %11 = vsyncpa [#allocation4], 0 }
   0x3   :  { %13 = vsyncpa [#allocation4 + $0x1], 0  ;;  %s722_s12 = smov 0   ;;  %s724_s13 = smov 0  }
   0x4   :  { %s726_s14 = smov 0   ;;  %s728_s15 = smov 0  }
   0x5 LB: > { %s743_s16 = sadd.s32 4294967295, %s695_s15   ;;  %s525_s17 = sadd.s32 4294967294, %s695_s15   ;;  %s695_s15 = sphi %s728_s15, %s1169_s15   ;;  %s691_s14 = sphi %s726_s14, %s1168_s14   ;;  %s687_s13 = sphi %s724_s13, %s1167_s13   ;;  %s683_s12 = sphi %s722_s12, %s1166_s12  }
   0x6   : > { %s747_s18 = sadd.s32 1, %s695_s15   ;;  %s26_s19 = sadd.s32 1, %s691_s14 }
   0x7   : > { %s23_s20 = ssub.s32 %s695_s15, %s747_s18  ;;  %p33_p0 = scmp.ne.s32.totalorder %s691_s14, %s687_s13 }
   0x8   : > { %p24_p1 = scmp.eq.s32.totalorder %s23_s20, 0  ;;  %p34_p2 = scmp.eq.s32.totalorder %s695_s15, 0 }
   0x9   : > { %p39_p3 = scmp.ne.s32.totalorder %s687_s13, %s683_s12  ;;  %p40_p4 = scmp.eq.s32.totalorder %s743_s16, 0 }
   0xa   : > { %s759_s21 = scalar_select %p24_p1, %s691_s14, %s26_s19  }
   0xb   : > { %p761_p5 = por %p34_p2, %p33_p0  ;;  %p765_p6 = por %p40_p4, %p39_p3 }
   0xc   : > { %p105_p7 = scmp.eq.s32.totalorder %s743_s16, 1  ;;  %p111_p8 = scmp.eq.s32.totalorder %s525_s17, 1 }
   0xd   : > { %p553_p10 = scmp.lt.s32.totalorder %s695_s15, 2  ;;  %s137_s26 = sand.u32 1, %s691_s14  }
   0xe   : > { %p772_p11 = por %p105_p7, %p33_p0  ;;  %p776_p12 = por %p111_p8, %p39_p3 }
   0xf   : > { %s539_s27 = sshll.u32 %s695_s15, 8  ;;  %s528_s28 = sshll.u32 %s137_s26, 8 }
  0x10   : > { %s146_s4 = scalar_lea.hbm %s1156_s0, %s539_s27  ;;  %s141_s6 = scalar_lea.vmem [#allocation2], %s528_s28 }
  0x11   : > { %s147_s5 = sshll.u32 %s146_s4, 4  ;;  %s149_s7 = sshll.u32 %s141_s6, 4  ;;  %s148_s5 = int_to_ptr.hbm [resolvable:$true] %s147_s5  ;;  %s150_s7 = int_to_ptr.vmem [resolvable:$true] %s149_s7 }
  0x12   : > { %p787_p13 = pnand %p553_p10, %p761_p5  ;;  %p531_p0 = scmp.ge.s32.totalorder %s695_s15, 1 }
  0x13   : > { %p157_p1 = scmp.lt.s32.totalorder %s695_s15, 3  ;;  %s138_s9 = scalar_lea.sflag [#allocation3], %s137_s26 }
  0x14   : > { %s599_s10 = sshra.s32 %s148_s5, 4  ;;  %p603_p3 = pneg %p787_p13  ;;  %s600_s10 = int_to_ptr.hbm [resolvable:$true] %s599_s10 }
  0x15   : > { %s601_s11 = scalar_lea.hbm %s600_s10, 256  ;;  %s606_s20 = scalar_lea.hbm %s1156_s0, 512 }
  0x16   : > { %p602_p2 = scmp.ne.s32.totalorder %s600_s10, %s601_s11  ;;  %p607_p5 = scmp.lt.s32.totalorder %s600_s10, %s1156_s0 }
  0x17   : > { %p608_p8 = scmp.lt.s32.totalorder %s606_s20, %s601_s11 }
  0x18   : > { %p604_p4 = pnand %p603_p3, %p602_p2 }
  0x19   : > { %p609_p10 = por %p608_p8, %p607_p5 }
  0x1a   : > { %p605_p7 = pneg %p604_p4 }
  0x1c   : > { %p610_p9 = pnand %p609_p10, %p605_p7 }
  0x1e   : > { %613 = shalt.err (!%p610_p9)
}
  0x1f   : > { %s697_s26 = smov 128   ;;  %s698_s28 = smov 8  }
  0x20   : > { %548 = dma.hbm_to_vmem [thread:$0]  (!%p787_p13), %s148_s5, 4096, %s150_s7, %s138_s9, %s697_s26, %s697_s26, %s698_s28  }
  0x21   : > { %p158_p2 = pnand %p531_p0, %p157_p1 }
  0x22   : > { %s808_s29 = sand.u32 (!%p158_p2), 1, %s687_s13  }
  0x23   : > { %161 = sbr.rel (%p158_p2) target bundleno = 323 (0x143), region = 32  ;;  %s532_s30 = sshll.u32 (!%p158_p2), %s808_s29, 8 }
  0x24   : > { %s164_s4 = scalar_lea.sflag (!%p158_p2), [#allocation3], %s808_s29  ;;  %s814_s6 = scalar_lea.vmem (!%p158_p2), [#allocation2], %s532_s30 }
  0x28   : > { %674 = dma.done.wait (%p765_p6), %s164_s4, 4096  }
  0x29   : > { %676 = vsyncadd (%p765_p6), %s164_s4, 4294963200  ;;  %v821_v0 = vld [vmem:[%s814_s6] sm:$0xff]  ;;  %v824_v1 = vld [vmem:[%s814_s6 + $0x8] sm:$0xff]  ;;  %s1015_s9 = scalar_lea.vmem [#allocation5], %s532_s30  ;;  %s540_s10 = sshll.u32 %s743_s16, 8 }
  0x2a   : > { %v827_v2 = vld [vmem:[%s814_s6 + $0x10] sm:$0xff]  ;;  %v830_v3 = vld [vmem:[%s814_s6 + $0x18] sm:$0xff]  ;;  %v223_v4 = vmul.f32 %v821_v0, %v821_v0  ;;  %v224_v5 = vmul.f32 %v824_v1, %v824_v1  ;;  %v839_v7 = vld [vmem:[%s814_s6 + $0x20] sm:$0xff]  ;;  %s448_s17 = scalar_lea.hbm %s1159_s3, %s540_s10  ;;  %s449_s19 = sshll.u32 %s1015_s9, 4  ;;  %s450_s19 = int_to_ptr.vmem [resolvable:$true] %s449_s19 }
  0x2b   : > { %v225_v6 = vmul.f32 %v827_v2, %v827_v2  ;;  %v226_v8 = vmul.f32 %v830_v3, %v830_v3  ;;  %v844_v10 = vld [vmem:[%s814_s6 + $0x28] sm:$0xff]  ;;  %v227_v11 = vmul.f32 %v839_v7, %v839_v7  ;;  %v849_v13 = vld [vmem:[%s814_s6 + $0x30] sm:$0xff]  ;;  %v854_v16 = vld [vmem:[%s814_s6 + $0x38] sm:$0xff]  ;;  %s451_s20 = sshll.u32 %s448_s17, 4  ;;  %s437_s22 = scalar_lea.sflag [#allocation4], %s808_s29  ;;  %s452_s20 = int_to_ptr.hbm [resolvable:$true] %s451_s20 }
  0x2c   : > { %v255_v9 = vadd.f32 %v224_v5, %v223_v4  ;;  %v228_v14 = vmul.f32 %v844_v10, %v844_v10  ;;  %v229_v17 = vmul.f32 %v849_v13, %v849_v13  ;;  %v859_v19 = vld [vmem:[%s814_s6 + $0x40] sm:$0xff]  ;;  %v230_v20 = vmul.f32 %v854_v16, %v854_v16  ;;  %v864_v22 = vld [vmem:[%s814_s6 + $0x48] sm:$0xff]  ;;  %v869_v25 = vld [vmem:[%s814_s6 + $0x50] sm:$0xff]  ;;  %s643_s27 = sshra.s32 %s452_s20, 4  ;;  %s649_s4 = scalar_lea.hbm %s1159_s3, 512  ;;  %s644_s27 = int_to_ptr.hbm [resolvable:$true] %s643_s27 }
  0x2d   : > { %v231_v23 = vmul.f32 %v859_v19, %v859_v19  ;;  %v232_v26 = vmul.f32 %v864_v22, %v864_v22  ;;  %v874_v28 = vld [vmem:[%s814_s6 + $0x58] sm:$0xff]  ;;  %v233_v29 = vmul.f32 %v869_v25, %v869_v25  ;;  %v879_v31 = vld [vmem:[%s814_s6 + $0x60] sm:$0xff]  ;;  %v884_v34 = vld [vmem:[%s814_s6 + $0x68] sm:$0xff]  ;;  %s645_s26 = scalar_lea.hbm %s644_s27, 256  ;;  %p650_p0 = scmp.lt.s32.totalorder %s644_s27, %s1159_s3 }
  0x2e   : > { %v256_v12 = vadd.f32 %v255_v9, %v225_v6  ;;  %v234_v32 = vmul.f32 %v874_v28, %v874_v28  ;;  %v235_v35 = vmul.f32 %v879_v31, %v879_v31  ;;  %v889_v37 = vld [vmem:[%s814_s6 + $0x70] sm:$0xff]  ;;  %v236_v38 = vmul.f32 %v884_v34, %v884_v34  ;;  %v894_v40 = vld [vmem:[%s814_s6 + $0x78] sm:$0xff]  ;;  %v899_v43 = vld [vmem:[%s814_s6 + $0x80] sm:$0xff]  ;;  %p646_p6 = scmp.ne.s32.totalorder %s644_s27, %s645_s26  ;;  %p651_p1 = scmp.lt.s32.totalorder %s649_s4, %s645_s26 }
  0x2f   : > { %v237_v41 = vmul.f32 %v889_v37, %v889_v37  ;;  %v238_v44 = vmul.f32 %v894_v40, %v894_v40  ;;  %v904_v46 = vld [vmem:[%s814_s6 + $0x88] sm:$0xff]  ;;  %v239_v47 = vmul.f32 %v899_v43, %v899_v43  ;;  %v909_v49 = vld [vmem:[%s814_s6 + $0x90] sm:$0xff]  ;;  %v914_v52 = vld [vmem:[%s814_s6 + $0x98] sm:$0xff] }
  0x30   : > { %v257_v15 = vadd.f32 %v256_v12, %v226_v8  ;;  %v240_v50 = vmul.f32 %v904_v46, %v904_v46  ;;  %v241_v53 = vmul.f32 %v909_v49, %v909_v49  ;;  %v919_v55 = vld [vmem:[%s814_s6 + $0xa0] sm:$0xff]  ;;  %v242_v56 = vmul.f32 %v914_v52, %v914_v52  ;;  %v924_v58 = vld [vmem:[%s814_s6 + $0xa8] sm:$0xff]  ;;  %v929_v61 = vld [vmem:[%s814_s6 + $0xb0] sm:$0xff]  ;;  %p647_p9 = pnand %p646_p6, %p772_p11  ;;  %p652_p3 = por %p651_p1, %p650_p0 }
  0x31   : > { %v243_v59 = vmul.f32 %v919_v55, %v919_v55  ;;  %v244_v62 = vmul.f32 %v924_v58, %v924_v58  ;;  %v934_v4 = vld [vmem:[%s814_s6 + $0xb8] sm:$0xff]  ;;  %v245_v5 = vmul.f32 %v929_v61, %v929_v61  ;;  %v939_v8 = vld [vmem:[%s814_s6 + $0xc0] sm:$0xff]  ;;  %v944_v12 = vld [vmem:[%s814_s6 + $0xc8] sm:$0xff] }
  0x32   : > { %v258_v18 = vadd.f32 %v257_v15, %v227_v11  ;;  %v246_v9 = vmul.f32 %v934_v4, %v934_v4  ;;  %p648_p13 = pneg %p647_p9 }
  0x34   : > { %v259_v21 = vadd.f32 %v258_v18, %v228_v14  ;;  %v247_v14 = vmul.f32 %v939_v8, %v939_v8  ;;  %v248_v18 = vmul.f32 %v944_v12, %v944_v12  ;;  %p653_p4 = pnand %p652_p3, %p648_p13 }
  0x36   : > { %v260_v24 = vadd.f32 %v259_v21, %v229_v17  ;;  %v949_v17 = vld [vmem:[%s814_s6 + $0xd0] sm:$0xff]  ;;  %v954_v21 = vld [vmem:[%s814_s6 + $0xd8] sm:$0xff] }
  0x38   : > { %v261_v27 = vadd.f32 %v260_v24, %v230_v20 }
  0x3a   : > { %v262_v30 = vadd.f32 %v261_v27, %v231_v23  ;;  %v249_v23 = vmul.f32 %v949_v17, %v949_v17  ;;  %v250_v27 = vmul.f32 %v954_v21, %v954_v21 }
  0x3c   : > { %v263_v33 = vadd.f32 %v262_v30, %v232_v26  ;;  %v959_v26 = vld [vmem:[%s814_s6 + $0xe0] sm:$0xff]  ;;  %v964_v30 = vld [vmem:[%s814_s6 + $0xe8] sm:$0xff] }
  0x3e   : > { %v264_v36 = vadd.f32 %v263_v33, %v233_v29 }
  0x40   : > { %v265_v39 = vadd.f32 %v264_v36, %v234_v32  ;;  %v251_v32 = vmul.f32 %v959_v26, %v959_v26  ;;  %v252_v36 = vmul.f32 %v964_v30, %v964_v30 }
  0x42   : > { %v266_v42 = vadd.f32 %v265_v39, %v235_v35  ;;  %v969_v35 = vld [vmem:[%s814_s6 + $0xf0] sm:$0xff]  ;;  %v974_v39 = vld [vmem:[%s814_s6 + $0xf8] sm:$0xff] }
  0x44   : > { %v267_v45 = vadd.f32 %v266_v42, %v236_v38 }
  0x46   : > { %v268_v48 = vadd.f32 %v267_v45, %v237_v41  ;;  %v253_v41 = vmul.f32 %v969_v35, %v969_v35 }
  0x48   : > { %v269_v51 = vadd.f32 %v268_v48, %v238_v44  ;;  %v254_v44 = vmul.f32 %v974_v39, %v974_v39 }
  0x4a   : > { %v270_v54 = vadd.f32 %v269_v51, %v239_v47 }
  0x4c   : > { %v271_v57 = vadd.f32 %v270_v54, %v240_v50 }
  0x4e   : > { %v272_v60 = vadd.f32 %v271_v57, %v241_v53 }
  0x50   : > { %v273_v63 = vadd.f32 %v272_v60, %v242_v56 }
  0x52   : > { %v274_v6 = vadd.f32 %v273_v63, %v243_v59 }
  0x54   : > { %v275_v11 = vadd.f32 %v274_v6, %v244_v62 }
  0x56   : > { %v276_v15 = vadd.f32 %v275_v11, %v245_v5 }
  0x58   : > { %v277_v20 = vadd.f32 %v276_v15, %v246_v9 }
  0x5a   : > { %v278_v24 = vadd.f32 %v277_v20, %v247_v14 }
  0x5c   : > { %v279_v29 = vadd.f32 %v278_v24, %v248_v18  ;;  %v699_v18 = vmov 128.0  }
  0x5e   : > { %v280_v33 = vadd.f32 %v279_v29, %v249_v23 }
  0x60   : > { %v281_v38 = vadd.f32 %v280_v33, %v250_v27 }
  0x62   : > { %v282_v42 = vadd.f32 %v281_v38, %v251_v32 }
  0x64   : > { %v283_v45 = vadd.f32 %v282_v42, %v252_v36 }
  0x66   : > { %v284_v47 = vadd.f32 %v283_v45, %v253_v41 }
  0x68   : > { %v285_v48 = vadd.f32 %v284_v47, %v254_v44 }
  0x6a   : > { %v286_v50 = vrot.slane %v285_v48, 4 }
  0x6c   : > { %v287_v51 = vadd.f32 %v286_v50, %v285_v48 }
  0x6e   : > { %v288_v53 = vrot.slane %v287_v51, 2 }
  0x70   : > { %v289_v54 = vadd.f32 %v288_v53, %v287_v51 }
  0x72   : > { %v290_v56 = vrot.slane %v289_v54, 1 }
  0x74   : > { %v291_v57 = vadd.f32 %v290_v56, %v289_v54  ;;  %v330_v56 = vld [vmem:[%s1157_s1] sm:$0x1] }
  0x76   : > { %593 = vrsqrt.f32 %v291_v57  ;;  %vm299_vm0 = vcmp.eq.f32.partialorder %v291_v57, inf  ;;  %v302_v9 = vand.u32 2147483648, %v291_v57  ;;  %vm301_vm1 = vcmp.eq.f32.partialorder %v291_v57, 0.0 }
  0x77   : > { %595 = vrcp.f32 %v699_v18 }
  0x7c   : > { %v594_v59 = vpop.eup %593 }
  0x7d   : > { %v293_v60 = vmul.f32 %v594_v59, %v291_v57  ;;  %v596_v20 = vpop.eup %595 }
  0x7e   : > { %v307_v23 = vmul.f32 128.0, %v596_v20  ;;  %vm311_vm2 = vweird.f32 %v596_v20 }
  0x7f   : > { %v294_v62 = vmul.f32 %v594_v59, %v293_v60 }
  0x80   : > { %v308_v24 = vsub.f32 1.0, %v307_v23 }
  0x81   : > { %v295_v63 = vmul.f32 0.5, %v294_v62 }
  0x82   : > { %v309_v27 = vmul.f32 %v596_v20, %v308_v24 }
  0x83   : > { %v296_v5 = vsub.f32 1.5, %v295_v63  ;;  %v988_v63 = vld [vmem:[%s1158_s2] ss:$0 sm:$0xff] }
  0x84   : > { %v310_v29 = vadd.f32 %v596_v20, %v309_v27 }
  0x85   : > { %v297_v6 = vmul.f32 %v594_v59, %v296_v5 }
  0x86   : > { %v312_v32 = vsel %vm311_vm2, %v596_v20, %v310_v29 }
  0x87   : > { %v298_v11 = vmul.f32 %v297_v6, %v291_v57 }
  0x89   : > { %v300_v14 = vsel %vm299_vm0, %v291_v57, %v298_v11 }
  0x8a   : > { %v303_v15 = vsel %vm301_vm1, %v302_v9, %v300_v14 }
  0x8b   : > { %304 = vadd.xlane.f32.xlu0 %v303_v15 }
  0xfe   : > { %v305_v33 = vpop.xlane.xlu0 %304 }
  0xff   : > { %v313_v36 = vmul.f32 %v312_v32, %v305_v33 }
 0x101   : > { %v314_v38 = vadd.f32 1e-06, %v313_v36 }
 0x103   : > { %597 = vrcp.f32 %v314_v38  ;;  %v326_v45 = vand.u32 2147483648, %v314_v38  ;;  %v324_v48 = vand.u32 2147483647, %v314_v38  ;;  %vm320_vm4 = vweird.f32 %v314_v38 }
 0x105   : > { %v327_v51 = vor.u32 1.1754944e-38, %v326_v45  ;;  %vm325_vm6 = vcmp.eq.f32.partialorder %v324_v48, 8.507059e+37 }
 0x109   : > { %v598_v41 = vpop.eup %597 }
 0x10a   : > { %v316_v42 = vmul.f32 %v598_v41, %v314_v38  ;;  %vm321_vm3 = vweird.f32 %v598_v41 }
 0x10b   : > { %vm322_vm5 = vmor %vm320_vm4, %vm321_vm3 }
 0x10c   : > { %v317_v44 = vsub.f32 1.0, %v316_v42 }
 0x10e   : > { %v318_v47 = vmul.f32 %v598_v41, %v317_v44 }
 0x110   : > { %v319_v50 = vadd.f32 %v598_v41, %v318_v47 }
 0x112   : > { %v323_v53 = vsel %vm322_vm5, %v598_v41, %v319_v50 }
 0x113   : > { %v328_v54 = vsel %vm325_vm6, %v327_v51, %v323_v53 }
 0x114   : > { %v329_v57 = vmul.f32 %v328_v54, %v303_v15 }
 0x116   : > { %v331_v59 = vmul.f32 %v330_v56, %v329_v57 }
 0x118   : > { %v332_v60 = vadd.f32 1.0, %v331_v59 }
 0x11a   : > { %v983_v62 = vperm.slane %v332_v60, 0 }
 0x11c   : > { %v336_v5 = vmul.f32 %v983_v62, %v821_v0  ;;  %v337_v6 = vmul.f32 %v983_v62, %v824_v1  ;;  %v338_v9 = vmul.f32 %v983_v62, %v827_v2  ;;  %v339_v11 = vmul.f32 %v983_v62, %v830_v3 }
 0x11d   : > { %v340_v14 = vmul.f32 %v983_v62, %v839_v7  ;;  %v341_v15 = vmul.f32 %v983_v62, %v844_v10  ;;  %v342_v18 = vmul.f32 %v983_v62, %v849_v13  ;;  %v343_v2 = vmul.f32 %v983_v62, %v854_v16 }
 0x11e   : > { %v372_v0 = vadd.f32 %v988_v63, %v336_v5  ;;  %v373_v20 = vadd.f32 %v988_v63, %v337_v6  ;;  %v374_v1 = vadd.f32 %v988_v63, %v338_v9  ;;  %v375_v3 = vadd.f32 %v988_v63, %v339_v11 }
 0x11f   : > { %v344_v7 = vmul.f32 %v983_v62, %v859_v19  ;;  %v376_v23 = vadd.f32 %v988_v63, %v340_v14  ;;  %v345_v10 = vmul.f32 %v983_v62, %v864_v22  ;;  %v377_v13 = vadd.f32 %v988_v63, %v341_v15 }
 0x120   : > { %404 = vst [vmem:[%s1015_s9] sm:$0xff] %v372_v0  ;;  %v346_v16 = vmul.f32 %v983_v62, %v869_v25  ;;  %v378_v19 = vadd.f32 %v988_v63, %v342_v18  ;;  %v347_v24 = vmul.f32 %v983_v62, %v874_v28  ;;  %v379_v27 = vadd.f32 %v988_v63, %v343_v2 }
 0x121   : > { %405 = vst [vmem:[%s1015_s9 + $0x8] sm:$0xff] %v373_v20  ;;  %v348_v22 = vmul.f32 %v983_v62, %v879_v31  ;;  %v380_v29 = vadd.f32 %v988_v63, %v344_v7  ;;  %v349_v25 = vmul.f32 %v983_v62, %v884_v34  ;;  %v381_v32 = vadd.f32 %v988_v63, %v345_v10 }
 0x122   : > { %406 = vst [vmem:[%s1015_s9 + $0x10] sm:$0xff] %v374_v1  ;;  %v350_v28 = vmul.f32 %v983_v62, %v889_v37  ;;  %v382_v33 = vadd.f32 %v988_v63, %v346_v16  ;;  %v351_v31 = vmul.f32 %v983_v62, %v894_v40  ;;  %v383_v36 = vadd.f32 %v988_v63, %v347_v24 }
 0x123   : > { %407 = vst [vmem:[%s1015_s9 + $0x18] sm:$0xff] %v375_v3  ;;  %v352_v34 = vmul.f32 %v983_v62, %v899_v43  ;;  %v384_v38 = vadd.f32 %v988_v63, %v348_v22  ;;  %v353_v37 = vmul.f32 %v983_v62, %v904_v46  ;;  %v385_v41 = vadd.f32 %v988_v63, %v349_v25 }
 0x124   : > { %408 = vst [vmem:[%s1015_s9 + $0x20] sm:$0xff] %v376_v23  ;;  %v354_v40 = vmul.f32 %v983_v62, %v909_v49  ;;  %v386_v42 = vadd.f32 %v988_v63, %v350_v28  ;;  %v355_v43 = vmul.f32 %v983_v62, %v914_v52  ;;  %v387_v44 = vadd.f32 %v988_v63, %v351_v31 }
 0x125   : > { %409 = vst [vmem:[%s1015_s9 + $0x28] sm:$0xff] %v377_v13  ;;  %v356_v46 = vmul.f32 %v983_v62, %v919_v55  ;;  %v388_v45 = vadd.f32 %v988_v63, %v352_v34  ;;  %v357_v49 = vmul.f32 %v983_v62, %v924_v58  ;;  %v389_v47 = vadd.f32 %v988_v63, %v353_v37 }
 0x126   : > { %410 = vst [vmem:[%s1015_s9 + $0x30] sm:$0xff] %v378_v19  ;;  %v358_v52 = vmul.f32 %v983_v62, %v929_v61  ;;  %v390_v48 = vadd.f32 %v988_v63, %v354_v40  ;;  %v359_v55 = vmul.f32 %v983_v62, %v934_v4  ;;  %v391_v50 = vadd.f32 %v988_v63, %v355_v43 }
 0x127   : > { %411 = vst [vmem:[%s1015_s9 + $0x38] sm:$0xff] %v379_v27  ;;  %v360_v58 = vmul.f32 %v983_v62, %v939_v8  ;;  %v392_v51 = vadd.f32 %v988_v63, %v356_v46  ;;  %v361_v61 = vmul.f32 %v983_v62, %v944_v12  ;;  %v393_v53 = vadd.f32 %v988_v63, %v357_v49 }
 0x128   : > { %412 = vst [vmem:[%s1015_s9 + $0x40] sm:$0xff] %v380_v29  ;;  %v362_v4 = vmul.f32 %v983_v62, %v949_v17  ;;  %v394_v54 = vadd.f32 %v988_v63, %v358_v52  ;;  %v363_v8 = vmul.f32 %v983_v62, %v954_v21  ;;  %v395_v56 = vadd.f32 %v988_v63, %v359_v55 }
 0x129   : > { %413 = vst [vmem:[%s1015_s9 + $0x48] sm:$0xff] %v381_v32  ;;  %v364_v12 = vmul.f32 %v983_v62, %v959_v26  ;;  %v396_v57 = vadd.f32 %v988_v63, %v360_v58  ;;  %v365_v17 = vmul.f32 %v983_v62, %v964_v30  ;;  %v397_v59 = vadd.f32 %v988_v63, %v361_v61 }
 0x12a   : > { %414 = vst [vmem:[%s1015_s9 + $0x50] sm:$0xff] %v382_v33  ;;  %v366_v21 = vmul.f32 %v983_v62, %v969_v35  ;;  %v398_v60 = vadd.f32 %v988_v63, %v362_v4  ;;  %v367_v26 = vmul.f32 %v983_v62, %v974_v39  ;;  %v399_v30 = vadd.f32 %v988_v63, %v363_v8 }
 0x12b   : > { %415 = vst [vmem:[%s1015_s9 + $0x58] sm:$0xff] %v383_v36  ;;  %v400_v35 = vadd.f32 %v988_v63, %v364_v12  ;;  %v401_v5 = vadd.f32 %v988_v63, %v365_v17 }
 0x12c   : > { %416 = vst [vmem:[%s1015_s9 + $0x60] sm:$0xff] %v384_v38  ;;  %v402_v6 = vadd.f32 %v988_v63, %v366_v21  ;;  %v403_v39 = vadd.f32 %v988_v63, %v367_v26 }
 0x12d   : > { %417 = vst [vmem:[%s1015_s9 + $0x68] sm:$0xff] %v385_v41 }
 0x12e   : > { %418 = vst [vmem:[%s1015_s9 + $0x70] sm:$0xff] %v386_v42 }
 0x12f   : > { %419 = vst [vmem:[%s1015_s9 + $0x78] sm:$0xff] %v387_v44 }
 0x130   : > { %420 = vst [vmem:[%s1015_s9 + $0x80] sm:$0xff] %v388_v45 }
 0x131   : > { %421 = vst [vmem:[%s1015_s9 + $0x88] sm:$0xff] %v389_v47 }
 0x132   : > { %422 = vst [vmem:[%s1015_s9 + $0x90] sm:$0xff] %v390_v48 }
 0x133   : > { %423 = vst [vmem:[%s1015_s9 + $0x98] sm:$0xff] %v391_v50 }
 0x134   : > { %424 = vst [vmem:[%s1015_s9 + $0xa0] sm:$0xff] %v392_v51 }
 0x135   : > { %425 = vst [vmem:[%s1015_s9 + $0xa8] sm:$0xff] %v393_v53 }
 0x136   : > { %426 = vst [vmem:[%s1015_s9 + $0xb0] sm:$0xff] %v394_v54 }
 0x137   : > { %427 = vst [vmem:[%s1015_s9 + $0xb8] sm:$0xff] %v395_v56 }
 0x138   : > { %428 = vst [vmem:[%s1015_s9 + $0xc0] sm:$0xff] %v396_v57 }
 0x139   : > { %429 = vst [vmem:[%s1015_s9 + $0xc8] sm:$0xff] %v397_v59 }
 0x13a   : > { %430 = vst [vmem:[%s1015_s9 + $0xd0] sm:$0xff] %v398_v60 }
 0x13b   : > { %431 = vst [vmem:[%s1015_s9 + $0xd8] sm:$0xff] %v399_v30 }
 0x13c   : > { %432 = vst [vmem:[%s1015_s9 + $0xe0] sm:$0xff] %v400_v35 }
 0x13d   : > { %433 = vst [vmem:[%s1015_s9 + $0xe8] sm:$0xff] %v401_v5 }
 0x13e   : > { %434 = vst [vmem:[%s1015_s9 + $0xf0] sm:$0xff] %v402_v6 }
 0x13f   : > { %435 = vst [vmem:[%s1015_s9 + $0xf8] sm:$0xff] %v403_v39 }
 0x140   : > { %656 = shalt.err (!%p653_p4)
}
 0x141   : > { %s700_s29 = smov 128   ;;  %s701_s5 = smov 8  }
 0x142   : > { %543 = dma.vmem_to_hbm [thread:$0]  (%p772_p11), %s450_s19, 4096, %s452_s20, %s437_s22, %s700_s29, %s700_s29, %s701_s5  }
 0x143 PF: > { %s466_s7 = sand.u32 1, %s683_s12   ;;  %p1165_p7 = scmp.ge.s32.totalorder %s695_s15, 2 }
 0x144   : > { %s467_s8 = scalar_lea.sflag [#allocation4], %s466_s7 }
 0x145   : > { %p550_p5 = pnand %p1165_p7, %p776_p12 }
 0x147   : > { %p551_p8 = pneg %p550_p5 }
 0x149   : > { %678 = dma.done.wait (%p551_p8), %s467_s8, 4096  }
 0x14a   : > { %680 = vsyncadd (%p551_p8), %s467_s8, 4294963200  ;;  %p16_p10 = scmp.ge.s32.totalorder %s747_s18, 4   ;;  %s1166_s12 = smov %s687_s13 }
 0x14b   : > { %s1167_s13 = smov %s691_s14  ;;  %s1168_s14 = smov %s759_s21 }
 0x14c   : > { %s1169_s15 = smov %s747_s18  ;;  %18 = sbr.rel (!%p16_p10) target bundleno = 5 (0x5), region = 77 }
 0x151   :  { %473 = vsyncpa [#allocation3], 1 }
 0x152   :  { %475 = vsyncpa [#allocation3 + $0x1], 1 }
 0x153   :  { %476 = vsyncpa [#allocation4], 1 }
 0x154   :  { %478 = vsyncpa [#allocation4 + $0x1], 1 }

</bundles_post_ra>
